<compile_context>
chip_gen: v6e
topology: v6e:2x2x1
jax: 0.10.0
libtpu: 0.0.40
codegen_flags: <defaults>
</compile_context>

<pallas_src>
import functools

import jax
import jax.numpy as jnp
from jax import lax
from jax.experimental import pallas as pl
from jax.experimental.pallas import tpu as pltpu


def _vmem_budget():
    """Per-generation (pixel-tile lane cap, scoped-VMEM limit in bytes)."""
    try:
        vmem_bytes = getattr(pltpu.get_tpu_info(), "vmem_capacity_bytes",
                             64 << 20)
    except Exception:  # pragma: no cover - conservative fallback
        vmem_bytes = 64 << 20
    if vmem_bytes <= (64 << 20):      # v7x: 64 MiB VMEM per TensorCore
        return 16384, 40 << 20
    return 32768, 80 << 20            # v5e / v6e: 128 MiB physical VMEM


def _pick_tile(hw, cap):
    """Largest tile (multiple of 128, <= cap) that divides HW; mask fallback."""
    cap = max(128, (cap // 128) * 128)
    if hw <= cap:
        return hw, False              # single full-extent tile, no mask
    t = cap
    while t >= 128:
        if hw % t == 0:
            return t, False           # divisor tile -> mask statically off
        t -= 128
    return cap, True                  # ragged fallback: masked last tile


def _combined_loss_kernel(logits_ref, targets_ref, ce_ref, dice_ref,
                          ce_acc, inter_acc, union_acc,
                          *, smooth, hw_total, needs_mask):
    h = pl.program_id(1)
    num_hw = pl.num_programs(1)

    @pl.when(h == 0)
    def _init():
        ce_acc[...] = jnp.zeros_like(ce_acc)
        inter_acc[...] = jnp.zeros_like(inter_acc)
        union_acc[...] = jnp.zeros_like(union_acc)

    x = logits_ref[0].astype(jnp.float32)        # (C, T): cast in-kernel
    t = targets_ref[0]                           # (1, T) int32
    C, T = x.shape

    # targets = where(targets == 255, 0, targets): the torch forward remaps
    # BEFORE CE, so ignore_index never triggers and every pixel counts.
    t = jnp.where(t == 255, jnp.int32(0), t)

    # (C,1) iota vs (1,T) targets -> (C,T) bool.  No (C,T) int32 iota and no
    # materialized f32 one-hot (bool drives jnp.where selects instead).
    cls = lax.broadcasted_iota(jnp.int32, (C, 1), 0)
    eq = cls == t                                # (C, T) bool

    if needs_mask:                               # static Python bool
        lane = lax.broadcasted_iota(jnp.int32, (1, T), 1)
        mask = (h * T + lane) < hw_total         # (1, T) valid-pixel mask
        x = jnp.where(mask, x, 0.0)              # keep padded columns finite
        eq = jnp.logical_and(eq, mask)

    # numerically-stable softmax / log-sum-exp over the class (sublane) axis
    m = jnp.max(x, axis=0, keepdims=True)        # (1, T)
    e = jnp.exp(x - m)                           # (C, T)
    s = jnp.sum(e, axis=0, keepdims=True)        # (1, T)
    probs = e * pl.reciprocal(s)                 # exact recip (dice parity)
    lse = m + jnp.log(s)                         # (1, T)

    # cross entropy partial: sum over pixels of (logsumexp - logit[target])
    x_at_t = jnp.sum(jnp.where(eq, x, 0.0), axis=0, keepdims=True)   # (1, T)
    ce_terms = lse - x_at_t
    if needs_mask:
        ce_terms = jnp.where(mask, ce_terms, 0.0)
    ce_acc[...] += jnp.sum(ce_terms, axis=(0, 1), keepdims=True)

    # dice partial sums per class (accumulated over pixel tiles)
    inter_acc[...] += jnp.sum(jnp.where(eq, probs, 0.0), axis=1,
                              keepdims=True)                          # (C, 1)
    if needs_mask:
        p_sum = jnp.sum(jnp.where(mask, probs, 0.0), axis=1, keepdims=True)
    else:
        p_sum = jnp.sum(probs, axis=1, keepdims=True)
    t_sum = jnp.sum(eq.astype(jnp.float32), axis=1, keepdims=True)
    union_acc[...] += p_sum + t_sum

    @pl.when(h == num_hw - 1)
    def _final():
        ce_ref[...] = jnp.broadcast_to(
            ce_acc[...].reshape(1, 1, 1), ce_ref.shape)
        dice = (2.0 * inter_acc[...] + smooth) / (union_acc[...] + smooth)
        dice_sum = jnp.sum(dice, axis=(0, 1), keepdims=True)          # (1, 1)
        dice_ref[...] = jnp.broadcast_to(
            dice_sum.reshape(1, 1, 1), dice_ref.shape)


def combined_loss(logits, targets, alpha=0.5, beta=0.5, smooth=1e-6):
    """logits: (N, C, H, W) float (any float dtype), targets: (N, H, W) int."""
    # TODO(synk): per-class CE weights (`weights=` in CombinedLoss) are not
    # implemented; only the default weights=None path is supported.
    N, C, H, W = logits.shape
    HW = H * W
    x = logits.reshape(N, C, HW)          # keep native dtype (bf16 halves HBM traffic)
    t = targets.reshape(N, 1, HW)
    if t.dtype != jnp.int32:
        t = t.astype(jnp.int32)
    # TODO(synk): targets could stream as uint8 (4x less target traffic); kept
    # int32 since the kernel is VPU-bound and narrow-int relayouts add risk.

    cap, vmem_limit = _vmem_budget()
    itemsize = jnp.dtype(x.dtype).itemsize
    # Working-set estimate per lane: ~6 live (C,T) f32 temps + double-buffered
    # logits input; keep it within ~half the scoped-VMEM budget.
    bytes_per_lane = C * (6 * 4 + 2 * itemsize) + 16
    cap = min(cap, max(128, ((vmem_limit // 2) // bytes_per_lane) // 128 * 128))
    tile_hw, needs_mask = _pick_tile(HW, cap)
    num_hw = pl.cdiv(HW, tile_hw)

    kernel = functools.partial(
        _combined_loss_kernel, smooth=smooth, hw_total=HW,
        needs_mask=needs_mask)

    ce_sums, dice_sums = pl.pallas_call(
        kernel,
        out_shape=(
            jax.ShapeDtypeStruct((N, 1, 128), jnp.float32),   # per-image CE sums
            jax.ShapeDtypeStruct((N, 1, 128), jnp.float32),   # per-image dice sums
        ),
        grid_spec=pltpu.PrefetchScalarGridSpec(
            num_scalar_prefetch=0,
            grid=(N, num_hw),                     # pixel reduction axis last
            in_specs=[
                pl.BlockSpec((1, C, tile_hw), lambda n, h: (n, 0, h)),
                pl.BlockSpec((1, 1, tile_hw), lambda n, h: (n, 0, h)),
            ],
            out_specs=[
                pl.BlockSpec((1, 1, 128), lambda n, h: (n, 0, 0)),
                pl.BlockSpec((1, 1, 128), lambda n, h: (n, 0, 0)),
            ],
            scratch_shapes=[
                pltpu.VMEM((1, 1), jnp.float32),   # CE partial-sum accumulator
                pltpu.VMEM((C, 1), jnp.float32),   # dice intersection per class
                pltpu.VMEM((C, 1), jnp.float32),   # dice union per class
            ],
        ),
        compiler_params=pltpu.CompilerParams(
            # TODO(synk): on v7x, CORE_PARALLEL / pl.core_map on the batch axis
            # would engage both TensorCores explicitly.
            dimension_semantics=("parallel", "arbitrary"),
            vmem_limit_bytes=vmem_limit,
        ),
    )(x, t)

    ce_loss = jnp.sum(ce_sums[:, 0, 0]) / jnp.float32(N * HW)
    dice_loss = 1.0 - jnp.sum(dice_sums[:, 0, 0]) / jnp.float32(N * C)
    return alpha * ce_loss + beta * dice_loss


if __name__ == "__main__":
    key = jax.random.PRNGKey(0)
    k_logits, k_targets = jax.random.split(key)

    N, C, H, W = 2, 4, 16, 16
    logits = jax.random.normal(k_logits, (N, C, H, W), dtype=jnp.float32)
    targets = jax.random.randint(k_targets, (N, H, W), 0, C, dtype=jnp.int32)
    # sprinkle a few ignore-index pixels (they get remapped to class 0,
    # exactly as the PyTorch forward does before both losses)
    targets = targets.at[0, 0, 0].set(255)
    targets = targets.at[1, 5, 7].set(255)

    loss = combined_loss(logits, targets)
    jax.block_until_ready(loss)
    print("KERNEL_OK")
</pallas_src>

<mosaic_0001>
module attributes {stable_mosaic.version = 11 : i64} {
  func.func @_combined_loss_kernel(%arg0: i32, %arg1: i32, %arg2: memref<1x4x256xf32, #tpu.memory_space<vmem>>, %arg3: memref<1x1x256xi32, #tpu.memory_space<vmem>>, %arg4: memref<1x1x128xf32, #tpu.memory_space<vmem>>, %arg5: memref<1x1x128xf32, #tpu.memory_space<vmem>>, %arg6: memref<1x1xf32, #tpu.memory_space<vmem>>, %arg7: memref<4x1xf32, #tpu.memory_space<vmem>>, %arg8: memref<4x1xf32, #tpu.memory_space<vmem>>) attributes {dimension_semantics = [#tpu.dimension_semantics<parallel>, #tpu.dimension_semantics<arbitrary>], iteration_bounds = array<i64: 2, 1>, scalar_prefetch = 0 : i64, scratch_operands = 3 : i64, tpu.core_type = #tpu.core_type<tc>, window_params = [{transform_indices = @transform_0, window_bounds = array<i64: 1, 4, 256>}, {transform_indices = @transform_1, window_bounds = array<i64: 1, 1, 256>}, {transform_indices = @transform_2, window_bounds = array<i64: 1, 1, 128>}, {transform_indices = @transform_3, window_bounds = array<i64: 1, 1, 128>}]} {
    %c0_i32 = arith.constant 0 : i32
    %0 = arith.cmpi eq, %arg1, %c0_i32 : i32
    %1 = arith.extui %0 : i1 to i32
    %c0_i32_0 = arith.constant 0 : i32
    %2 = arith.cmpi ne, %1, %c0_i32_0 : i32
    scf.if %2 {
      %cst_29 = arith.constant 0.000000e+00 : f32
      %60 = vector.broadcast %cst_29 : f32 to vector<1x1xf32>
      %c0_30 = arith.constant 0 : index
      %c0_31 = arith.constant 0 : index
      %61 = vector.load %arg6[%c0_30, %c0_31] : memref<1x1xf32, #tpu.memory_space<vmem>>, vector<1x1xf32>
      tpu.vector_store %arg6[%c0_30, %c0_31], %60 {strides = array<i32>} : memref<1x1xf32, #tpu.memory_space<vmem>>, vector<1x1xf32>,
      %cst_32 = arith.constant 0.000000e+00 : f32
      %62 = vector.broadcast %cst_32 : f32 to vector<4x1xf32>
      %c0_33 = arith.constant 0 : index
      %c0_34 = arith.constant 0 : index
      %63 = vector.load %arg7[%c0_33, %c0_34] : memref<4x1xf32, #tpu.memory_space<vmem>>, vector<4x1xf32>
      tpu.vector_store %arg7[%c0_33, %c0_34], %62 {strides = array<i32>} : memref<4x1xf32, #tpu.memory_space<vmem>>, vector<4x1xf32>,
      %cst_35 = arith.constant 0.000000e+00 : f32
      %64 = vector.broadcast %cst_35 : f32 to vector<4x1xf32>
      %c0_36 = arith.constant 0 : index
      %c0_37 = arith.constant 0 : index
      %65 = vector.load %arg8[%c0_36, %c0_37] : memref<4x1xf32, #tpu.memory_space<vmem>>, vector<4x1xf32>
      tpu.vector_store %arg8[%c0_36, %c0_37], %64 {strides = array<i32>} : memref<4x1xf32, #tpu.memory_space<vmem>>, vector<4x1xf32>,
    } else {
    }
    %c0 = arith.constant 0 : index
    %c0_1 = arith.constant 0 : index
    %c0_2 = arith.constant 0 : index
    %3 = vector.load %arg2[%c0, %c0_1, %c0_2] : memref<1x4x256xf32, #tpu.memory_space<vmem>>, vector<1x4x256xf32>
    %4 = vector.shape_cast %3 : vector<1x4x256xf32> to vector<4x256xf32>
    %c0_3 = arith.constant 0 : index
    %c0_4 = arith.constant 0 : index
    %c0_5 = arith.constant 0 : index
    %5 = vector.load %arg3[%c0_3, %c0_4, %c0_5] : memref<1x1x256xi32, #tpu.memory_space<vmem>>, vector<1x1x256xi32>
    %6 = vector.shape_cast %5 : vector<1x1x256xi32> to vector<1x256xi32>
    %c255_i32 = arith.constant 255 : i32
    %7 = vector.broadcast %c255_i32 : i32 to vector<1x256xi32>
    %8 = arith.cmpi eq, %6, %7 : vector<1x256xi32>
    %c0_i32_6 = arith.constant 0 : i32
    %9 = vector.broadcast %c0_i32_6 : i32 to vector<1x256xi32>
    %10 = arith.select %8, %9, %6 : vector<1x256xi1>, vector<1x256xi32>
    %11 = tpu.iota {dimensions = array<i32: 0>} : vector<4x1xi32>
    %12 = vector.broadcast %11 : vector<4x1xi32> to vector<4x256xi32>
    %13 = vector.broadcast %10 : vector<1x256xi32> to vector<4x256xi32>
    %14 = arith.cmpi eq, %12, %13 : vector<4x256xi32>
    %cst = arith.constant dense<0xFF800000> : vector<256xf32>
    %15 = vector.multi_reduction <maximumf>, %4, %cst [0] : vector<4x256xf32> to vector<256xf32>
    %16 = vector.shape_cast %15 : vector<256xf32> to vector<1x256xf32>
    %17 = vector.broadcast %16 : vector<1x256xf32> to vector<4x256xf32>
    %18 = arith.subf %4, %17 : vector<4x256xf32>
    %19 = math.exp %18 : vector<4x256xf32>
    %cst_7 = arith.constant dense<0.000000e+00> : vector<256xf32>
    %20 = vector.multi_reduction <add>, %19, %cst_7 [0] : vector<4x256xf32> to vector<256xf32>
    %21 = vector.shape_cast %20 : vector<256xf32> to vector<1x256xf32>
    %22 = tpu.reciprocal %21 : vector<1x256xf32> -> vector<1x256xf32>
    %23 = vector.broadcast %22 : vector<1x256xf32> to vector<4x256xf32>
    %24 = arith.mulf %19, %23 : vector<4x256xf32>
    %25 = math.log %21 : vector<1x256xf32>
    %26 = arith.addf %16, %25 : vector<1x256xf32>
    %cst_8 = arith.constant 0.000000e+00 : f32
    %27 = vector.broadcast %cst_8 : f32 to vector<4x256xf32>
    %28 = arith.select %14, %4, %27 : vector<4x256xi1>, vector<4x256xf32>
    %cst_9 = arith.constant dense<0.000000e+00> : vector<256xf32>
    %29 = vector.multi_reduction <add>, %28, %cst_9 [0] : vector<4x256xf32> to vector<256xf32>
    %30 = vector.shape_cast %29 : vector<256xf32> to vector<1x256xf32>
    %31 = arith.subf %26, %30 : vector<1x256xf32>
    %c0_10 = arith.constant 0 : index
    %c0_11 = arith.constant 0 : index
    %32 = vector.load %arg6[%c0_10, %c0_11] : memref<1x1xf32, #tpu.memory_space<vmem>>, vector<1x1xf32>
    %33 = vector.shape_cast %31 : vector<1x256xf32> to vector<1x1x256xf32>
    %cst_12 = arith.constant dense<0.000000e+00> : vector<1xf32>
    %34 = vector.multi_reduction <add>, %33, %cst_12 [1, 2] : vector<1x1x256xf32> to vector<1xf32>
    %35 = vector.shape_cast %34 : vector<1xf32> to vector<1x1x1xf32>
    %36 = vector.extract %35[0, 0, 0] : f32 from vector<1x1x1xf32>
    %37 = vector.broadcast %36 : f32 to vector<1x1xf32>
    %38 = arith.addf %32, %37 : vector<1x1xf32>
    %c0_13 = arith.constant 0 : index
    %c0_14 = arith.constant 0 : index
    %39 = vector.load %arg6[%c0_13, %c0_14] : memref<1x1xf32, #tpu.memory_space<vmem>>, vector<1x1xf32>
    tpu.vector_store %arg6[%c0_13, %c0_14], %38 {strides = array<i32>} : memref<1x1xf32, #tpu.memory_space<vmem>>, vector<1x1xf32>,
    %c0_15 = arith.constant 0 : index
    %c0_16 = arith.constant 0 : index
    %40 = vector.load %arg7[%c0_15, %c0_16] : memref<4x1xf32, #tpu.memory_space<vmem>>, vector<4x1xf32>
    %cst_17 = arith.constant 0.000000e+00 : f32
    %41 = vector.broadcast %cst_17 : f32 to vector<4x256xf32>
    %42 = arith.select %14, %24, %41 : vector<4x256xi1>, vector<4x256xf32>
    %cst_18 = arith.constant dense<0.000000e+00> : vector<4xf32>
    %43 = vector.multi_reduction <add>, %42, %cst_18 [1] : vector<4x256xf32> to vector<4xf32>
    %44 = vector.shape_cast %43 : vector<4xf32> to vector<4x1xf32>
    %45 = arith.addf %40, %44 : vector<4x1xf32>
    %c0_19 = arith.constant 0 : index
    %c0_20 = arith.constant 0 : index
    %46 = vector.load %arg7[%c0_19, %c0_20] : memref<4x1xf32, #tpu.memory_space<vmem>>, vector<4x1xf32>
    tpu.vector_store %arg7[%c0_19, %c0_20], %45 {strides = array<i32>} : memref<4x1xf32, #tpu.memory_space<vmem>>, vector<4x1xf32>,
    %cst_21 = arith.constant dense<0.000000e+00> : vector<4xf32>
    %47 = vector.multi_reduction <add>, %24, %cst_21 [1] : vector<4x256xf32> to vector<4xf32>
    %48 = vector.shape_cast %47 : vector<4xf32> to vector<4x1xf32>
    %49 = arith.extui %14 : vector<4x256xi1> to vector<4x256xi32>
    %50 = arith.sitofp %49 : vector<4x256xi32> to vector<4x256xf32>
    %cst_22 = arith.constant dense<0.000000e+00> : vector<4xf32>
    %51 = vector.multi_reduction <add>, %50, %cst_22 [1] : vector<4x256xf32> to vector<4xf32>
    %52 = vector.shape_cast %51 : vector<4xf32> to vector<4x1xf32>
    %c0_23 = arith.constant 0 : index
    %c0_24 = arith.constant 0 : index
    %53 = vector.load %arg8[%c0_23, %c0_24] : memref<4x1xf32, #tpu.memory_space<vmem>>, vector<4x1xf32>
    %54 = arith.addf %48, %52 : vector<4x1xf32>
    %55 = arith.addf %53, %54 : vector<4x1xf32>
    %c0_25 = arith.constant 0 : index
    %c0_26 = arith.constant 0 : index
    %56 = vector.load %arg8[%c0_25, %c0_26] : memref<4x1xf32, #tpu.memory_space<vmem>>, vector<4x1xf32>
    tpu.vector_store %arg8[%c0_25, %c0_26], %55 {strides = array<i32>} : memref<4x1xf32, #tpu.memory_space<vmem>>, vector<4x1xf32>,
    %c0_i32_27 = arith.constant 0 : i32
    %57 = arith.cmpi eq, %arg1, %c0_i32_27 : i32
    %58 = arith.extui %57 : i1 to i32
    %c0_i32_28 = arith.constant 0 : i32
    %59 = arith.cmpi ne, %58, %c0_i32_28 : i32
    scf.if %59 {
      %c0_29 = arith.constant 0 : index
      %c0_30 = arith.constant 0 : index
      %60 = vector.load %arg6[%c0_29, %c0_30] : memref<1x1xf32, #tpu.memory_space<vmem>>, vector<1x1xf32>
      %61 = vector.shape_cast %60 : vector<1x1xf32> to vector<1x1x1xf32>
      %62 = vector.shape_cast %61 : vector<1x1x1xf32> to vector<1x1x1xf32>
      %63 = vector.broadcast %62 : vector<1x1x1xf32> to vector<1x1x128xf32>
      %c0_31 = arith.constant 0 : index
      %c0_32 = arith.constant 0 : index
      %c0_33 = arith.constant 0 : index
      %64 = vector.load %arg4[%c0_31, %c0_32, %c0_33] : memref<1x1x128xf32, #tpu.memory_space<vmem>>, vector<1x1x128xf32>
      tpu.vector_store %arg4[%c0_31, %c0_32, %c0_33], %63 {strides = array<i32>} : memref<1x1x128xf32, #tpu.memory_space<vmem>>, vector<1x1x128xf32>,
      %c0_34 = arith.constant 0 : index
      %c0_35 = arith.constant 0 : index
      %65 = vector.load %arg7[%c0_34, %c0_35] : memref<4x1xf32, #tpu.memory_space<vmem>>, vector<4x1xf32>
      %cst_36 = arith.constant 2.000000e+00 : f32
      %66 = vector.broadcast %cst_36 : f32 to vector<4x1xf32>
      %67 = arith.mulf %66, %65 : vector<4x1xf32>
      %cst_37 = arith.constant 9.99999997E-7 : f32
      %68 = vector.broadcast %cst_37 : f32 to vector<4x1xf32>
      %69 = arith.addf %67, %68 : vector<4x1xf32>
      %c0_38 = arith.constant 0 : index
      %c0_39 = arith.constant 0 : index
      %70 = vector.load %arg8[%c0_38, %c0_39] : memref<4x1xf32, #tpu.memory_space<vmem>>, vector<4x1xf32>
      %cst_40 = arith.constant 9.99999997E-7 : f32
      %71 = vector.broadcast %cst_40 : f32 to vector<4x1xf32>
      %72 = arith.addf %70, %71 : vector<4x1xf32>
      %73 = arith.divf %69, %72 : vector<4x1xf32>
      %74 = vector.shape_cast %73 : vector<4x1xf32> to vector<1x4x1xf32>
      %cst_41 = arith.constant dense<0.000000e+00> : vector<1xf32>
      %75 = vector.multi_reduction <add>, %74, %cst_41 [1, 2] : vector<1x4x1xf32> to vector<1xf32>
      %76 = vector.shape_cast %75 : vector<1xf32> to vector<1x1x1xf32>
      %77 = vector.extract %76[0, 0, 0] : f32 from vector<1x1x1xf32>
      %78 = vector.broadcast %77 : f32 to vector<1x1xf32>
      %79 = vector.shape_cast %78 : vector<1x1xf32> to vector<1x1x1xf32>
      %80 = vector.shape_cast %79 : vector<1x1x1xf32> to vector<1x1x1xf32>
      %81 = vector.broadcast %80 : vector<1x1x1xf32> to vector<1x1x128xf32>
      %c0_42 = arith.constant 0 : index
      %c0_43 = arith.constant 0 : index
      %c0_44 = arith.constant 0 : index
      %82 = vector.load %arg5[%c0_42, %c0_43, %c0_44] : memref<1x1x128xf32, #tpu.memory_space<vmem>>, vector<1x1x128xf32>
      tpu.vector_store %arg5[%c0_42, %c0_43, %c0_44], %81 {strides = array<i32>} : memref<1x1x128xf32, #tpu.memory_space<vmem>>, vector<1x1x128xf32>,
    } else {
    }
    return
  }
  func.func @transform_0(%arg0: i32, %arg1: i32) -> (i32, i32, i32) {
    %c0_i32 = arith.constant 0 : i32
    %c0_i32_0 = arith.constant 0 : i32
    return %arg0, %c0_i32, %arg1 : i32, i32, i32
  }
  func.func @transform_1(%arg0: i32, %arg1: i32) -> (i32, i32, i32) {
    %c0_i32 = arith.constant 0 : i32
    %c0_i32_0 = arith.constant 0 : i32
    return %arg0, %c0_i32, %arg1 : i32, i32, i32
  }
  func.func @transform_2(%arg0: i32, %arg1: i32) -> (i32, i32, i32) {
    %c0_i32 = arith.constant 0 : i32
    %c0_i32_0 = arith.constant 0 : i32
    %c0_i32_1 = arith.constant 0 : i32
    return %arg0, %c0_i32, %c0_i32_0 : i32, i32, i32
  }
  func.func @transform_3(%arg0: i32, %arg1: i32) -> (i32, i32, i32) {
    %c0_i32 = arith.constant 0 : i32
    %c0_i32_0 = arith.constant 0 : i32
    %c0_i32_1 = arith.constant 0 : i32
    return %arg0, %c0_i32, %c0_i32_0 : i32, i32, i32
  }
}

</mosaic_0001>

<bundles_post_ra>
// kernel: tpu_custom_call.1
= control target key start
LH: loop header
LB: loop body
LE: loop exit
PB: predicated region body
PF: predicated region fallthrough
CT: control target
= control target key end

     0   :  { %9 = vsyncpa [#allocation6], 0  ;;  %s1147_s0 = inlined_call_operand.hbm [shape: f32[2,4,256], index: 0, kind: input, shape index: {}]   ;;  %s1148_s1 = inlined_call_operand.hbm [shape: s32[2,1,256], index: 1, kind: input, shape index: {}]   ;;  %s1149_s2 = inlined_call_operand.hbm [shape: f32[2,1,128], index: 2, kind: output, shape index: {0}]   ;;  %s1150_s3 = inlined_call_operand.hbm [shape: f32[2,1,128], index: 3, kind: output, shape index: {1}]  }
   0x1   :  { %11 = vsyncpa [#allocation6 + $0x1], 0 }
   0x2   :  { %12 = vsyncpa [#allocation9], 0 }
   0x3   :  { %14 = vsyncpa [#allocation9 + $0x1], 0 }
   0x4   :  { %15 = vsyncpa [#allocation7], 0 }
   0x5   :  { %17 = vsyncpa [#allocation7 + $0x1], 0 }
   0x6   :  { %18 = vsyncpa [#allocation12], 0 }
   0x7   :  { %20 = vsyncpa [#allocation12 + $0x1], 0  ;;  %s910_s12 = smov 0   ;;  %s912_s13 = smov 0  }
   0x8   :  { %s914_s14 = smov 0   ;;  %s916_s15 = smov 0  }
   0x9   :  { %s918_s16 = smov 0   ;;  %s920_s17 = smov 0  }
   0xa LB: > { %s598_s18 = sadd.s32 4294967295, %s882_s17   ;;  %s599_s19 = sadd.s32 4294967294, %s882_s17   ;;  %s882_s17 = sphi %s920_s17, %s26_s17   ;;  %s878_s16 = sphi %s918_s16, %s1162_s16   ;;  %s874_s15 = sphi %s916_s15, %s1161_s15   ;;  %s870_s14 = sphi %s914_s14, %s1160_s14   ;;  %s866_s13 = sphi %s912_s13, %s1159_s13   ;;  %s862_s12 = sphi %s910_s12, %s1158_s12  }
   0xb   : > { %s38_s20 = sadd.s32 1, %s878_s16  ;;  %s47_s21 = sadd.s32 1, %s870_s14 }
   0xc   : > { %p40_p0 = scmp.ge.s32.totalorder %s38_s20, 2  ;;  %p54_p1 = scmp.ne.s32.totalorder %s870_s14, %s866_s13 }
   0xd   : > { %p55_p2 = scmp.eq.s32.totalorder %s882_s17, 0  ;;  %p60_p3 = scmp.ne.s32.totalorder %s866_s13, %s862_s12 }
   0xe   : > { %s1164_s20 = smov (%p40_p0, %s38_s20), 0  ;;  %p61_p5 = scmp.eq.s32.totalorder %s598_s18, 0 }
   0xf   : > { %p951_p4 = por %p55_p2, %p54_p1  ;;  %s42_s23 = ssub.s32 %s878_s16, %s1164_s20 }
  0x10   : > { %p112_p6 = scmp.eq.s32.totalorder %s598_s18, 1  ;;  %p45_p7 = scmp.eq.s32.totalorder %s42_s23, 0 }
  0x11   : > { %p957_p8 = por %p61_p5, %p60_p3  ;;  %p118_p10 = scmp.eq.s32.totalorder %s599_s19, 1 }
  0x12   : > { %p961_p9 = por %p112_p6, %p54_p1  ;;  %p645_p13 = scmp.lt.s32.totalorder %s882_s17, 2 }
  0x13   : > { %s966_s26 = scalar_select %p45_p7, %s870_s14, %s47_s21  }
  0x14   : > { %p968_p11 = por %p118_p10, %p60_p3  ;;  %s975_s28 = sand.u32 1, %s870_s14  }
  0x15   : > { %s602_s29 = sshll.u32 %s975_s28, 3  ;;  %s617_s30 = sshll.u32 %s878_s16, 7 }
  0x16   : > { %s176_s6 = scalar_lea.hbm %s1147_s0, %s617_s30  ;;  %s168_s7 = scalar_lea.vmem [#allocation5], %s602_s29 }
  0x17   : > { %s178_s8 = sshll.u32 %s168_s7, 4  ;;  %p984_p0 = pnand %p645_p13, %p951_p4  ;;  %s179_s8 = int_to_ptr.vmem [resolvable:$true] %s178_s8 }
  0x18   : > { %p608_p1 = scmp.ge.s32.totalorder %s882_s17, 1  ;;  %p204_p2 = scmp.lt.s32.totalorder %s882_s17, 3 }
  0x19   : > { %s165_s10 = scalar_lea.sflag [#allocation6], %s975_s28  ;;  %p714_p3 = pneg %p984_p0 }
  0x1a   : > { %s725_s11 = scalar_lea.vmem %s179_s8, 128  ;;  %s884_s18 = smov [#allocation5]  }
  0x1b   : > { %p726_p5 = scmp.ne.s32.totalorder %s179_s8, %s725_s11  ;;  %s730_s19 = sshll.u32 %s884_s18, 4  ;;  %s731_s19 = int_to_ptr.vmem [resolvable:$false] %s730_s19 }
  0x1c   : > { %s732_s21 = scalar_lea.vmem %s731_s19, 256  ;;  %p733_p4 = scmp.lt.s32.totalorder %s179_s8, %s731_s19 }
  0x1d   : > { %p728_p6 = pnand %p726_p5, %p714_p3  ;;  %p734_p10 = scmp.lt.s32.totalorder %s732_s21, %s725_s11 }
  0x1f   : > { %p729_p7 = pneg %p728_p6  ;;  %p735_p13 = por %p734_p10, %p733_p4 }
  0x21   : > { %p736_p12 = pnand %p735_p13, %p729_p7 }
  0x23   : > { %739 = shalt.err (!%p736_p12)
}
  0x24   : > { %634 = dma.hbm_to_vmem [thread:$0]  (!%p984_p0), %s176_s6, 128, %s179_s8, %s165_s10  }
  0x25   : > { %p1002_p5 = pnand %p608_p1, %p204_p2  ;;  %s605_s23 = sshll.u32 %s975_s28, 1 }
  0x26   : > { %s618_s29 = sshll.u32 %s878_s16, 5  ;;  %s189_s7 = scalar_lea.vmem [#allocation8], %s605_s23 }
  0x27   : > { %s197_s5 = scalar_lea.hbm %s1148_s1, %s618_s29  ;;  %s199_s11 = sshll.u32 %s189_s7, 4  ;;  %s200_s11 = int_to_ptr.vmem [resolvable:$true] %s199_s11 }
  0x28   : > { %s186_s18 = scalar_lea.sflag [#allocation9], %s975_s28  ;;  %s753_s19 = scalar_lea.vmem %s200_s11, 32 }
  0x29   : > { %p754_p12 = scmp.ne.s32.totalorder %s200_s11, %s753_s19  ;;  %s885_s6 = smov [#allocation8]  }
  0x2a   : > { %s758_s8 = sshll.u32 %s885_s6, 4  ;;  %s759_s8 = int_to_ptr.vmem [resolvable:$false] %s758_s8 }
  0x2b   : > { %p756_p6 = pnand %p754_p12, %p714_p3  ;;  %s760_s10 = scalar_lea.vmem %s759_s8, 64 }
  0x2c   : > { %p761_p1 = scmp.lt.s32.totalorder %s200_s11, %s759_s8  ;;  %p762_p2 = scmp.lt.s32.totalorder %s760_s10, %s753_s19 }
  0x2d   : > { %p757_p7 = pneg %p756_p6 }
  0x2e   : > { %p763_p4 = por %p762_p2, %p761_p1 }
  0x30   : > { %p764_p10 = pnand %p763_p4, %p757_p7 }
  0x32   : > { %767 = shalt.err (!%p764_p10)
}
  0x33   : > { %637 = dma.hbm_to_vmem [thread:$0]  (!%p984_p0), %s197_s5, 32, %s200_s11, %s186_s18  }
  0x34   : > { %208 = sbr.rel (%p1002_p5) target bundleno = 522 (0x20a), region = 28  ;;  %s1020_s28 = sand.u32 (!%p1002_p5), 1, %s866_s13  }
  0x35   : > { %s609_s21 = sshll.u32 (!%p1002_p5), %s1020_s28, 3  ;;  %s211_s23 = scalar_lea.sflag (!%p1002_p5), [#allocation6], %s1020_s28 }
  0x36   : > { %s214_s29 = scalar_lea.vmem (!%p1002_p5), [#allocation5], %s609_s21 }
  0x39   : > { %845 = dma.done.wait (%p957_p8), %s211_s23, 128  }
  0x3a   : > { %847 = vsyncadd (%p957_p8), %s211_s23, 4294967168  ;;  %s610_s9 = sshll.u32 %s1020_s28, 1  ;;  %s220_s22 = scalar_lea.sflag [#allocation9], %s1020_s28 }
  0x3b   : > { %s223_s30 = scalar_lea.vmem [#allocation8], %s610_s9 }
  0x3c   : > { %849 = dma.done.wait (%p957_p8), %s220_s22, 32  }
  0x3d   : > { %851 = vsyncadd (%p957_p8), %s220_s22, 4294967264  ;;  %vm284_vm0 = vcmask 1043456   ;;  %v265_v0 = vld [vmem:[%s214_s29] sm:$0xff]  ;;  %v269_v19 = vlaneseq  ;;  %v266_v20 = vld [vmem:[%s223_s30] sm:$0x3]  ;;  %vm355_vm4 = vcmask 1040384  }
  0x3e   : > { %v282_v1 = vcombine.high %v265_v0, %v265_v0  ;;  %v285_v2 = vsel %vm284_vm0, %v265_v0, -inf  ;;  %vm267_vm1 = vcmp.eq.s32.totalorder %v266_v20, 255  ;;  %vm262_vm5 = vcmask 3072   ;;  %s613_s4 = sshll.u32 %s874_s15, 4  ;;  %s247_s5 = scalar_lea.vmem [#allocation10], %s1020_s28 }
  0x3f   : > { %v286_v3 = vrot.slane %v285_v2, 4  ;;  %v1039_v21 = vshrl.u32 %v269_v19, 7  ;;  %v268_v23 = vsel %vm267_vm1, 0, %v266_v20  ;;  %vm260_vm6 = vcmask 0   ;;  %s454_s7 = sshll.u32 %s247_s5, 4  ;;  %s452_s19 = scalar_lea.hbm %s1149_s2, %s613_s4  ;;  %s455_s7 = int_to_ptr.vmem [resolvable:$true] %s454_s7 }
  0x40   : > { %v292_v4 = vsel %vm284_vm0, %v282_v1, -inf  ;;  %s438_s6 = scalar_lea.sflag [#allocation7], %s1020_s28  ;;  %s768_s8 = scalar_lea.vmem %s455_s7, 16 }
  0x41   : > { %v287_v5 = vmax.f32 %v285_v2, %v286_v3  ;;  %v293_v6 = vrot.slane %v292_v4, 4  ;;  %v273_v22 = vsub.s32 0, %v1039_v21  ;;  %v277_v24 = vsub.s32 1, %v1039_v21  ;;  %p769_p8 = scmp.ne.s32.totalorder %s455_s7, %s768_s8  ;;  %s888_s10 = smov [#allocation10]  }
  0x42   : > { %s772_s21 = sshll.u32 %s888_s10, 4  ;;  %s773_s21 = int_to_ptr.vmem [resolvable:$false] %s772_s21 }
  0x43   : > { %v288_v7 = vrot.slane %v287_v5, 2  ;;  %v294_v8 = vmax.f32 %v292_v4, %v293_v6  ;;  %v274_v25 = vrot.slane %v268_v23, %v273_v22  ;;  %v278_v27 = vrot.slane %v268_v23, %v277_v24  ;;  %p770_p0 = pnand %p769_p8, %p961_p9  ;;  %s774_s23 = scalar_lea.vmem %s773_s21, 32 }
  0x44   : > { %v886_v4 = vmov 0.0   ;;  %p775_p13 = scmp.lt.s32.totalorder %s455_s7, %s773_s21  ;;  %p776_p5 = scmp.lt.s32.totalorder %s774_s23, %s768_s8 }
  0x45   : > { %v289_v9 = vmax.f32 %v287_v5, %v288_v7  ;;  %v295_v10 = vrot.slane %v294_v8, 2  ;;  %vm279_vm2 = vcmp.eq.s32.totalorder %v1039_v21, %v274_v25  ;;  %vm280_vm3 = vcmp.eq.s32.totalorder %v1039_v21, %v278_v27  ;;  %264 = vst.msk [vmem:[#allocation4] sm:$0xf] %vm262_vm5, %v886_v4  ;;  %263 = vst.msk [vmem:[#allocation3] sm:$0xf] %vm262_vm5, %v886_v4  ;;  %p771_p3 = pneg %p770_p0 }
  0x46   : > { %v336_v32 = vsel %vm279_vm2, %v265_v0, 0.0  ;;  %v337_v35 = vsel %vm280_vm3, %v282_v1, 0.0  ;;  %v611_v5 = vsel %vm279_vm2, 1.0, %v886_v4  ;;  %v612_v6 = vsel %vm280_vm3, 1.0, %v886_v4  ;;  %261 = vst.msk [vmem:[#allocation2] sm:$0x1] %vm260_vm6, %v886_v4  ;;  %p777_p12 = por %p776_p5, %p775_p13 }
  0x47   : > { %v290_v11 = vrot.slane %v289_v9, 1  ;;  %v296_v12 = vmax.f32 %v294_v8, %v295_v10  ;;  %v338_v38 = vsel %vm284_vm0, %v336_v32, 0.0  ;;  %v345_v41 = vsel %vm284_vm0, %v337_v35, 0.0 }
  0x48   : > { %v339_v42 = vrot.slane %v338_v38, 4  ;;  %v346_v45 = vrot.slane %v345_v41, 4  ;;  %v887_v27 = vmov 0   ;;  %p778_p6 = pnand %p777_p12, %p771_p3 }
  0x49   : > { %v291_v13 = vmax.f32 %v289_v9, %v290_v11  ;;  %v297_v14 = vrot.slane %v296_v12, 1  ;;  %697 = vset.pattern.permute.xlu1 %v887_v27  ;;  %698 = vset.pattern.permute.xlu0 %v887_v27 }
  0x4a   : > { %v340_v48 = vadd.f32 %v339_v42, %v338_v38  ;;  %v347_v50 = vadd.f32 %v346_v45, %v345_v41 }
  0x4b   : > { %v1036_v15 = vmax.f32 %v296_v12, %v297_v14 }
  0x4c   : > { %v341_v51 = vrot.slane %v340_v48, 2  ;;  %v348_v52 = vrot.slane %v347_v50, 2 }
  0x4d   : > { %v301_v16 = vcombine.low %v291_v13, %v1036_v15 }
  0x4e   : > { %v342_v53 = vadd.f32 %v341_v51, %v340_v48  ;;  %v349_v54 = vadd.f32 %v348_v52, %v347_v50  ;;  %v354_v51 = vld [vmem:[#allocation2] sm:$0x1] }
  0x4f   : > { %v303_v17 = vsub.f32 %v265_v0, %v301_v16  ;;  %v395_v16 = vsel %vm284_vm0, %v611_v5, 0.0 }
  0x50   : > { %v343_v55 = vrot.slane %v342_v53, 1  ;;  %v350_v57 = vrot.slane %v349_v54, 1 }
  0x51   : > { %v304_v18 = vmul.f32 1.442695, %v303_v17  ;;  %v396_v17 = vsel %vm284_vm0, %v612_v6, 0.0 }
  0x52   : > { %v344_v61 = vadd.f32 %v343_v55, %v342_v53  ;;  %v351_v2 = vadd.f32 %v350_v57, %v349_v54  ;;  %v397_v25 = vadd.f32 %v396_v17, %v395_v16 }
  0x53   : > { %700 = vpow2.f32 %v304_v18 }
  0x60   : > { %v701_v26 = vpop.eup %700 }
  0x61   : > { %v307_v28 = vcombine.high %v701_v26, %v701_v26  ;;  %v309_v29 = vsel %vm284_vm0, %v701_v26, 0.0 }
  0x62   : > { %v310_v30 = vrot.slane %v309_v29, 4 }
  0x63   : > { %v316_v31 = vsel %vm284_vm0, %v307_v28, 0.0  ;;  %v372_v28 = vld [vmem:[#allocation3] sm:$0xf] }
  0x64   : > { %v311_v33 = vadd.f32 %v310_v30, %v309_v29  ;;  %v317_v34 = vrot.slane %v316_v31, 4 }
  0x66   : > { %v312_v36 = vrot.slane %v311_v33, 2  ;;  %v318_v37 = vadd.f32 %v317_v34, %v316_v31 }
  0x68   : > { %v313_v39 = vadd.f32 %v312_v36, %v311_v33  ;;  %v319_v40 = vrot.slane %v318_v37, 2  ;;  %v400_v33 = vld [vmem:[#allocation4] sm:$0xf] }
  0x6a   : > { %v314_v43 = vrot.slane %v313_v39, 1  ;;  %v320_v44 = vadd.f32 %v319_v40, %v318_v37 }
  0x6c   : > { %v315_v46 = vadd.f32 %v314_v43, %v313_v39  ;;  %v321_v47 = vrot.slane %v320_v44, 1 }
  0x6e   : > { %v322_v49 = vadd.f32 %v321_v47, %v320_v44  ;;  %702 = vrcp.f32 %v315_v46 }
  0x6f   : > { %704 = vlog2.f32 %v315_v46 }
  0x70   : > { %706 = vrcp.f32 %v322_v49 }
  0x71   : > { %708 = vlog2.f32 %v322_v49 }
  0x7b   : > { %v703_v56 = vpop.eup %702 }
  0x7c   : > { %v705_v58 = vpop.eup %704 }
  0x7d   : > { %v707_v59 = vpop.eup %706  ;;  %v331_v60 = vmul.f32 0.6931472, %v705_v58 }
  0x7e   : > { %v709_v62 = vpop.eup %708  ;;  %v327_v63 = vcombine.low %v703_v56, %v707_v59 }
  0x7f   : > { %v333_v0 = vmul.f32 0.6931472, %v709_v62  ;;  %v334_v1 = vadd.f32 %v331_v60, %v291_v13 }
  0x80   : > { %v329_v3 = vmul.f32 %v701_v26, %v327_v63 }
  0x81   : > { %v335_v7 = vadd.f32 %v333_v0, %v1036_v15  ;;  %v352_v8 = vsub.f32 %v334_v1, %v344_v61 }
  0x82   : > { %v374_v9 = vcombine.high %v329_v3, %v329_v3  ;;  %v386_v10 = vsel %vm284_vm0, %v329_v3, 0.0  ;;  %v376_v11 = vsel %vm279_vm2, %v329_v3, 0.0 }
  0x83   : > { %v378_v12 = vsel %vm284_vm0, %v376_v11, 0.0  ;;  %v353_v13 = vsub.f32 %v335_v7, %v351_v2  ;;  %v356_v20 = vsel %vm355_vm4, %v352_v8, 0.0 }
  0x84   : > { %v387_v14 = vsel %vm284_vm0, %v374_v9, 0.0  ;;  %v377_v15 = vsel %vm280_vm3, %v374_v9, 0.0 }
  0x85   : > { %v388_v18 = vadd.f32 %v387_v14, %v386_v10  ;;  %v379_v19 = vsel %vm284_vm0, %v377_v15, 0.0  ;;  %v357_v23 = vsel %vm355_vm4, %v353_v13, 0.0 }
  0x86   : > { %v380_v24 = vadd.f32 %v379_v19, %v378_v12  ;;  %v358_v26 = vadd.f32 %v357_v23, %v356_v20 }
  0x87   : > { %389 = vadd.xlane.f32.xlu0 %v388_v18 }
  0x88   : > { %381 = vadd.xlane.f32.xlu1 %v380_v24 }
  0x8b   : > { %398 = vadd.xlane.f32.xlu0 %v397_v25 }
  0x8c   : > { %359 = vadd.xlane.f32.xlu1 %v358_v26 }
 0x110   : > { %v390_v29 = vpop.xlane.xlu0 %389 }
 0x111   : > { %v382_v30 = vpop.xlane.xlu1 %381 }
 0x112   : > { %v383_v31 = vadd.f32 %v382_v30, %v372_v28 }
 0x114   : > { %v399_v32 = vpop.xlane.xlu0 %398  ;;  %385 = vst.msk [vmem:[#allocation3] sm:$0xf] %vm262_vm5, %v383_v31 }
 0x115   : > { %v401_v34 = vadd.f32 %v399_v32, %v390_v29  ;;  %v360_v35 = vpop.xlane.xlu1 %359 }
 0x116   : > { %v361_v36 = vrot.slane %v360_v35, 4 }
 0x117   : > { %v402_v37 = vadd.f32 %v401_v34, %v400_v33 }
 0x118   : > { %v362_v38 = vadd.f32 %v361_v36, %v360_v35 }
 0x119   : > { %403 = vst.msk [vmem:[#allocation4] sm:$0xf] %vm262_vm5, %v402_v37 }
 0x11a   : > { %v363_v39 = vrot.slane %v362_v38, 2 }
 0x11b   : > { %v418_v45 = vld [vmem:[#allocation3] sm:$0xf] }
 0x11c   : > { %v364_v40 = vadd.f32 %v363_v39, %v362_v38  ;;  %v419_v46 = vmul.f32 2.0, %v418_v45 }
 0x11e   : > { %v365_v41 = vrot.slane %v364_v40, 1  ;;  %v420_v47 = vadd.f32 1e-06, %v419_v46 }
 0x120   : > { %v421_v42 = vld [vmem:[#allocation4] sm:$0xf]  ;;  %v366_v43 = vadd.f32 %v365_v41, %v364_v40 }
 0x121   : > { %v422_v44 = vadd.f32 1e-06, %v421_v42 }
 0x122   : > { %619 = vpush %v366_v43 }
 0x123   : > { %710 = vrcp.f32 %v422_v44 }
 0x130   : > { %v711_v48 = vpop.eup %710 }
 0x131   : > { %v424_v49 = vmul.f32 %v711_v48, %v420_v47 }
 0x133   : > { %v425_v50 = vsel %vm262_vm5, %v424_v49, 0.0 }
 0x134   : > { %426 = vadd.xlane.f32.xlu0 %v425_v50 }
 0x153   : > { %s620_s24 = spop %619 }
 0x154   : > { %v368_v52 = vstv %s620_s24 }
 0x155   : > { %v369_v53 = vadd.f32 %v368_v52, %v354_v51 }
 0x157   : > { %371 = vst.msk [vmem:[#allocation2] sm:$0x1] %vm260_vm6, %v369_v53 }
 0x15e   : > { %v407_v54 = vld [vmem:[#allocation2] sm:$0x1] }
 0x15f   : > { %410 = vperm.xlu1 %697, %v407_v54  }
 0x1bd   : > { %v427_v55 = vpop.xlane.xlu0 %426 }
 0x1be   : > { %v428_v56 = vrot.slane %v427_v55, 4 }
 0x1c0   : > { %v429_v57 = vadd.f32 %v428_v56, %v427_v55 }
 0x1c2   : > { %v430_v58 = vrot.slane %v429_v57, 2 }
 0x1c4   : > { %v431_v59 = vadd.f32 %v430_v58, %v429_v57 }
 0x1c6   : > { %v432_v60 = vrot.slane %v431_v59, 1 }
 0x1c8   : > { %v433_v61 = vadd.f32 %v432_v60, %v431_v59 }
 0x1ca   : > { %621 = vpush %v433_v61 }
 0x1da   : > { %v411_v62 = vpop.permute.xlu1 %410 }
 0x1db   : > { %v416_v63 = vrot.slane %v411_v62, %v273_v22 }
 0x1dd   : > { %417 = vst [vmem:[%s247_s5] sm:$0x1] %v416_v63 }
 0x1de   : > { %781 = shalt.err (!%p778_p6)
}
 0x1df   : > { %s782_s29 = scalar_lea.hbm %s452_s19, 16  ;;  %s786_s30 = scalar_lea.hbm %s1149_s2, 32 }
 0x1e0   : > { %p783_p7 = scmp.ne.s32.totalorder %s452_s19, %s782_s29  ;;  %p787_p4 = scmp.lt.s32.totalorder %s452_s19, %s1149_s2 }
 0x1e1   : > { %p788_p10 = scmp.lt.s32.totalorder %s786_s30, %s782_s29 }
 0x1e2   : > { %p784_p1 = pnand %p783_p7, %p961_p9 }
 0x1e3   : > { %p789_p8 = por %p788_p10, %p787_p4 }
 0x1e4   : > { %p785_p2 = pneg %p784_p1 }
 0x1e6   : > { %p790_p0 = pnand %p789_p8, %p785_p2 }
 0x1e8   : > { %793 = shalt.err (!%p790_p0)
}
 0x1e9   : > { %627 = dma.vmem_to_hbm [thread:$0]  (%p961_p9), %s455_s7, 16, %s452_s19, %s438_s6  }
 0x1ea   : > { %s253_s11 = scalar_lea.vmem [#allocation11], %s1020_s28  ;;  %s465_s23 = scalar_lea.hbm %s1150_s3, %s613_s4 }
 0x1eb   : > { %s467_s18 = sshll.u32 %s253_s11, 4  ;;  %s442_s29 = scalar_lea.sflag [#allocation12], %s1020_s28  ;;  %s1100_s18 = int_to_ptr.vmem [resolvable:$true] %s467_s18 }
 0x1ec   : > { %s794_s9 = scalar_lea.vmem %s1100_s18, 16  ;;  %s889_s7 = smov [#allocation11]  }
 0x1ed   : > { %p795_p3 = scmp.ne.s32.totalorder %s1100_s18, %s794_s9  ;;  %s798_s19 = sshll.u32 %s889_s7, 4  ;;  %s799_s19 = int_to_ptr.vmem [resolvable:$false] %s798_s19 }
 0x1ee   : > { %s800_s6 = scalar_lea.vmem %s799_s19, 32  ;;  %p801_p12 = scmp.lt.s32.totalorder %s1100_s18, %s799_s19 }
 0x1ef   : > { %p796_p13 = pnand %p795_p3, %p961_p9  ;;  %p802_p6 = scmp.lt.s32.totalorder %s800_s6, %s794_s9 }
 0x1f1   : > { %p797_p5 = pneg %p796_p13  ;;  %p803_p7 = por %p802_p6, %p801_p12 }
 0x1f3   : > { %p804_p1 = pnand %p803_p7, %p797_p5 }
 0x1fb   : > { %s622_s8 = spop %621 }
 0x1fc   : > { %v435_v21 = vstv %s622_s8 }
 0x1fd   : > { %436 = vst [vmem:[%s253_s11] sm:$0x1] %v435_v21 }
 0x1fe   : > { %807 = shalt.err (!%p804_p1)
}
 0x1ff   : > { %s808_s15 = scalar_lea.hbm %s465_s23, 16  ;;  %s812_s22 = scalar_lea.hbm %s1150_s3, 32 }
 0x200   : > { %p809_p2 = scmp.ne.s32.totalorder %s465_s23, %s808_s15  ;;  %p813_p8 = scmp.lt.s32.totalorder %s465_s23, %s1150_s3 }
 0x201   : > { %p814_p0 = scmp.lt.s32.totalorder %s812_s22, %s808_s15 }
 0x202   : > { %p810_p4 = pnand %p809_p2, %p961_p9 }
 0x203   : > { %p815_p3 = por %p814_p0, %p813_p8 }
 0x204   : > { %p811_p10 = pneg %p810_p4 }
 0x206   : > { %p816_p13 = pnand %p815_p3, %p811_p10 }
 0x208   : > { %819 = shalt.err (!%p816_p13)
}
 0x209   : > { %628 = dma.vmem_to_hbm [thread:$0]  (%p961_p9), %s1100_s18, 16, %s465_s23, %s442_s29  }
 0x20a PF: > { %s479_s5 = sand.u32 1, %s862_s12   ;;  %p1157_p5 = scmp.ge.s32.totalorder %s882_s17, 2 }
 0x20b   : > { %s480_s11 = scalar_lea.sflag [#allocation7], %s479_s5 }
 0x20c   : > { %p639_p12 = pnand %p1157_p5, %p968_p11 }
 0x20e   : > { %p640_p6 = pneg %p639_p12 }
 0x210   : > { %853 = dma.done.wait (%p640_p6), %s480_s11, 16  }
 0x211   : > { %855 = vsyncadd (%p640_p6), %s480_s11, 4294967280  ;;  %s488_s8 = scalar_lea.sflag [#allocation12], %s479_s5 }
 0x212   : > { %857 = dma.done.wait (%p640_p6), %s488_s8, 16  }
 0x213   : > { %859 = vsyncadd (%p640_p6), %s488_s8, 4294967280  ;;  %s26_s17 = sadd.s32 1, %s882_s17   ;;  %s1158_s12 = smov %s866_s13 }
 0x214   : > { %p23_p7 = scmp.ge.s32.totalorder %s26_s17, 4   ;;  %s1159_s13 = smov %s870_s14 }
 0x215   : > { %s1160_s14 = smov %s966_s26  ;;  %s1161_s15 = smov %s878_s16 }
 0x216   : > { %s1162_s16 = smov %s1164_s20  ;;  %25 = sbr.rel (!%p23_p7) target bundleno = 10 (0xa), region = 111 }
 0x21b   :  { %492 = vsyncpa [#allocation6], 1 }
 0x21c   :  { %494 = vsyncpa [#allocation6 + $0x1], 1 }
 0x21d   :  { %495 = vsyncpa [#allocation9], 1 }
 0x21e   :  { %497 = vsyncpa [#allocation9 + $0x1], 1 }
 0x21f   :  { %498 = vsyncpa [#allocation7], 1 }
 0x220   :  { %500 = vsyncpa [#allocation7 + $0x1], 1 }
 0x221   :  { %501 = vsyncpa [#allocation12], 1 }
 0x222   :  { %503 = vsyncpa [#allocation12 + $0x1], 1 }

</bundles_post_ra>
